<compile_context>
chip_gen: v5e
topology: v5e:2x2
jax: 0.10.0
libtpu: 0.0.40
codegen_flags: <defaults>
</compile_context>

<pallas_src>
import functools

import jax
import jax.numpy as jnp
from jax.experimental import pallas as pl
from jax.experimental.pallas import tpu as pltpu

_MIB = 1024 * 1024

# Widest lane-dense slab width that divides the element count (prefer wider).
_WIDTHS = (4096, 2048, 1024, 512, 256, 128)


def _quant_kernel(x_ref, o_ref, *, qmin, qmax):
    # Widen to f32 in-kernel (VPU slack is huge; the kernel is DMA-bound).
    x = x_ref[...].astype(jnp.float32)
    x = jnp.clip(x, qmin, qmax)
    # torch: (x * 255.0).type(torch.uint8) truncates toward zero; values are
    # >= 0 after the clamp (qmin >= 0 enforced in the wrapper), so floor
    # reproduces the exact quantization levels.
    q = jnp.floor(x * 255.0)
    o_ref[...] = q * (1.0 / 255.0)


def _jnp_quant(x, qmin, qmax):
    """Pure-jnp reference / tiny-tail path (same math as the kernel)."""
    x = jnp.clip(x.astype(jnp.float32), qmin, qmax)
    return jnp.floor(x * 255.0) * (1.0 / 255.0)


def _tuning():
    """Per-generation (target f32 elems per block, vmem_limit_bytes)."""
    vmem_cap = None
    try:
        info = pltpu.get_tpu_info()
        vmem_cap = getattr(info, "vmem_capacity_bytes", None)
    except Exception:
        vmem_cap = None
    if vmem_cap is None:
        # Conservative fallback: 2 MiB f32 blocks, 32 MiB limit (safe on all
        # generations; double-buffered in+out = 8 MiB).
        return 512 * 1024, 32 * _MIB
    if vmem_cap <= 80 * _MIB:
        # v7x-class (64 MiB VMEM, ~3.2 TB/s HBM): 8 MiB f32 blocks amortize
        # the ~0.35us per-step overhead; 2 bufs x (in+out) = 32 MiB <= 48 MiB.
        return 2 * 1024 * 1024, 48 * _MIB
    # v5e / v6e (128 MiB physical VMEM): 4 MiB blocks hit ~85% of the HBM
    # roofline; explicit 64 MiB limit clears v5e's 16 MiB scoped default.
    return 1024 * 1024, 64 * _MIB


def _run_kernel_2d(x2d, qmin, qmax):
    """Run the quantization kernel over a (rows, width) slab; returns f32."""
    rows, width = x2d.shape
    target_block_elems, vmem_limit = _tuning()

    # Dtype-aware sublane alignment: 8 rows for 4-byte, 16 for 2-byte,
    # 32 for 1-byte inputs (keeps packed stores/loads unmasked).  The f32
    # output needs 8, which every entry already satisfies.
    itemsize = int(jnp.dtype(x2d.dtype).itemsize)
    align = {1: 32, 2: 16, 4: 8}.get(itemsize, 8)

    # Block rows: target ~target_block_elems f32 elements per block.
    target_rows = max(1, target_block_elems // width)
    if target_rows >= rows:
        block_rows = rows                       # full extent (no align needed)
    else:
        block_rows = max(align, (target_rows // align) * align)
        if block_rows > rows:
            block_rows = rows

    # Keep >= 4 grid steps when there is enough data so the "parallel" grid
    # axis can shard across v7x's two TensorCores without imbalance.
    if rows >= 4 * align:
        cap = max(align, ((rows // 4) // align) * align)
        block_rows = min(block_rows, cap)

    grid = (pl.cdiv(rows, block_rows),)

    # NOTE: qmin/qmax are baked as compile-time constants; each distinct
    # (min, max) pair compiles its own kernel (numerics unaffected).
    kernel = functools.partial(_quant_kernel, qmin=float(qmin), qmax=float(qmax))

    # TODO(synk): add input_output_aliases={0: 0} for callers that donate a
    # float32 input (in/out dtypes must match for aliasing to apply).
    return pl.pallas_call(
        kernel,
        out_shape=jax.ShapeDtypeStruct((rows, width), jnp.float32),
        grid_spec=pltpu.PrefetchScalarGridSpec(
            num_scalar_prefetch=0,
            grid=grid,
            in_specs=[pl.BlockSpec((block_rows, width), lambda i: (i, 0))],
            out_specs=pl.BlockSpec((block_rows, width), lambda i: (i, 0)),
        ),
        compiler_params=pltpu.CompilerParams(
            dimension_semantics=("parallel",),
            vmem_limit_bytes=vmem_limit,
        ),
    )(x2d)


def quantization_forward(x, qmin=0.0, qmax=1.0):
    """Pallas equivalent of Quantization()(x, min, max). Returns float32."""
    if not (0.0 <= float(qmin) <= float(qmax) <= 1.0):
        # Outside [0, 1] torch's uint8 cast wraps mod 256; we do not emulate it.
        raise ValueError("quantization_forward requires 0 <= min <= max <= 1")

    orig_shape = x.shape
    total = int(x.size)
    flat = jnp.ravel(x)  # keep original dtype; cast happens inside the kernel

    # Common case: a lane-dense width divides the element count exactly.
    width = next((w for w in _WIDTHS if total % w == 0), None)
    if width is not None:
        y2d = _run_kernel_2d(flat.reshape(total // width, width), qmin, qmax)
        return y2d.reshape(orig_shape)

    # Ragged fallback: kernel on the multiple-of-128 prefix, jnp on the tail.
    width = 128
    main = (total // width) * width
    if main == 0:
        # Fewer than 128 elements: not worth a kernel launch.
        return _jnp_quant(flat, qmin, qmax).reshape(orig_shape)
    y_head = _run_kernel_2d(flat[:main].reshape(main // width, width), qmin, qmax)
    y_tail = _jnp_quant(flat[main:], qmin, qmax)
    return jnp.concatenate([y_head.reshape(-1), y_tail]).reshape(orig_shape)


if __name__ == "__main__":
    key = jax.random.PRNGKey(0)
    k1, k2, k3 = jax.random.split(key, 3)

    # f32 input with values outside [0, 1] to exercise the clamp.
    x_f32 = jax.random.uniform(
        k1, (2, 4, 16, 16), dtype=jnp.float32, minval=-0.5, maxval=1.5)
    y = quantization_forward(x_f32, 0.0, 1.0)
    jax.block_until_ready(y)
    assert y.shape == x_f32.shape and y.dtype == jnp.float32
    assert jnp.array_equal(y, _jnp_quant(x_f32, 0.0, 1.0)), "f32 mismatch"

    # bf16 input: widened to f32 inside the kernel; output stays f32 (torch).
    x_bf16 = jax.random.uniform(
        k2, (4, 8, 32), dtype=jnp.float32, minval=-0.25, maxval=1.25
    ).astype(jnp.bfloat16)
    y_bf = quantization_forward(x_bf16)
    jax.block_until_ready(y_bf)
    assert y_bf.dtype == jnp.float32
    assert jnp.array_equal(y_bf, _jnp_quant(x_bf16, 0.0, 1.0)), "bf16 mismatch"

    # Odd size (total % 128 != 0): kernel on the prefix, jnp on the tail.
    x_odd = jax.random.uniform(
        k3, (17, 33), dtype=jnp.float32, minval=-0.5, maxval=1.5)
    y_odd = quantization_forward(x_odd)
    jax.block_until_ready(y_odd)
    assert y_odd.shape == x_odd.shape and y_odd.dtype == jnp.float32
    assert jnp.array_equal(y_odd, _jnp_quant(x_odd, 0.0, 1.0)), "odd-size mismatch"

    print("KERNEL_OK")
</pallas_src>

<mosaic_0001>
module attributes {stable_mosaic.version = 11 : i64} {
  func.func @_quant_kernel(%arg0: i32, %arg1: memref<1x2048xf32, #tpu.memory_space<vmem>>, %arg2: memref<1x2048xf32, #tpu.memory_space<vmem>>) attributes {dimension_semantics = [#tpu.dimension_semantics<parallel>], iteration_bounds = array<i64: 1>, scalar_prefetch = 0 : i64, scratch_operands = 0 : i64, tpu.core_type = #tpu.core_type<tc>, window_params = [{transform_indices = @transform_0, window_bounds = array<i64: 1, 2048>}, {transform_indices = @transform_1, window_bounds = array<i64: 1, 2048>}]} {
    %c0 = arith.constant 0 : index
    %c0_0 = arith.constant 0 : index
    %0 = vector.load %arg1[%c0, %c0_0] : memref<1x2048xf32, #tpu.memory_space<vmem>>, vector<1x2048xf32>
    %cst = arith.constant 0.000000e+00 : f32
    %cst_1 = arith.constant 1.000000e+00 : f32
    %1 = vector.broadcast %cst : f32 to vector<1x2048xf32>
    %2 = arith.maximumf %1, %0 : vector<1x2048xf32>
    %3 = vector.broadcast %cst_1 : f32 to vector<1x2048xf32>
    %4 = arith.minimumf %3, %2 : vector<1x2048xf32>
    %cst_2 = arith.constant 2.550000e+02 : f32
    %5 = vector.broadcast %cst_2 : f32 to vector<1x2048xf32>
    %6 = arith.mulf %4, %5 : vector<1x2048xf32>
    %7 = math.floor %6 : vector<1x2048xf32>
    %cst_3 = arith.constant 0.00392156886 : f32
    %8 = vector.broadcast %cst_3 : f32 to vector<1x2048xf32>
    %9 = arith.mulf %7, %8 : vector<1x2048xf32>
    %c0_4 = arith.constant 0 : index
    %c0_5 = arith.constant 0 : index
    %10 = vector.load %arg2[%c0_4, %c0_5] : memref<1x2048xf32, #tpu.memory_space<vmem>>, vector<1x2048xf32>
    tpu.vector_store %arg2[%c0_4, %c0_5], %9 {strides = array<i32>} : memref<1x2048xf32, #tpu.memory_space<vmem>>, vector<1x2048xf32>,
    return
  }
  func.func @transform_0(%arg0: i32) -> (i32, i32) {
    %c0_i32 = arith.constant 0 : i32
    %c0_i32_0 = arith.constant 0 : i32
    return %arg0, %c0_i32 : i32, i32
  }
  func.func @transform_1(%arg0: i32) -> (i32, i32) {
    %c0_i32 = arith.constant 0 : i32
    %c0_i32_0 = arith.constant 0 : i32
    return %arg0, %c0_i32 : i32, i32
  }
}

</mosaic_0001>

<bundles_post_ra>
// kernel: tpu_custom_call.1
= control target key start
LH: loop header
LB: loop body
LE: loop exit
PB: predicated region body
PF: predicated region fallthrough
CT: control target
= control target key end

     0   :  { %6 = vsyncpa [#allocation3], 0  ;;  %s126_s0 = inlined_call_operand.hbm [shape: f32[1,2048], index: 0, kind: input, shape index: {}]   ;;  %s127_s1 = inlined_call_operand.hbm [shape: f32[1,2048], index: 1, kind: output, shape index: {}]  }
   0x1   :  { %7 = vsyncpa [#allocation4], 0  ;;  %s13_s8 = sshll.u32 %s126_s0, 4  ;;  %s108_s9 = smov [#allocation2]   ;;  %s14_s8 = int_to_ptr.hbm [resolvable:$true] %s13_s8 }
   0x2   :  { %s15_s10 = sshll.u32 %s108_s9, 4  ;;  %s16_s10 = int_to_ptr.vmem [resolvable:$true] %s15_s10 }
   0x3   :  { %18 = dma.hbm_to_vmem [thread:$0]  %s14_s8, 256, %s16_s10, [#allocation3]  }
   0x4   :  { %104 = dma.done.wait [#allocation3], 256  }
   0x5   :  { %105 = vsyncadd [#allocation3], 4294967040  ;;  %v23_v0 = vld [vmem:[#allocation2] sm:$0xff]  ;;  %v24_v1 = vld [vmem:[#allocation2 + $0x8] sm:$0xff]  ;;  %s109_s11 = smov [#allocation5]   ;;  %s44_s14 = sshll.u32 %s127_s1, 4  ;;  %s45_s14 = int_to_ptr.hbm [resolvable:$true] %s44_s14 }
   0x6   :  { %v25_v2 = vmax.f32 %v23_v0, 0.0  ;;  %v26_v3 = vmax.f32 %v24_v1, 0.0  ;;  %s42_s12 = sshll.u32 %s109_s11, 4  ;;  %s43_s12 = int_to_ptr.vmem [resolvable:$true] %s42_s12 }
   0x8   :  { %v27_v4 = vmin.f32 %v25_v2, 1.0  ;;  %v28_v5 = vmin.f32 %v26_v3, 1.0 }
   0xa   :  { %v29_v6 = vmul.f32 255.0, %v27_v4  ;;  %v30_v7 = vmul.f32 255.0, %v28_v5 }
   0xc   :  { %v31_v8 = vfloor.f32 %v29_v6  ;;  %v32_v9 = vfloor.f32 %v30_v7 }
   0xe   :  { %v33_v10 = vmul.f32 0.003921569, %v31_v8  ;;  %v34_v11 = vmul.f32 0.003921569, %v32_v9 }
  0x10   :  { %35 = vst [vmem:[#allocation5] sm:$0xff] %v33_v10 }
  0x11   :  { %36 = vst [vmem:[#allocation5 + $0x8] sm:$0xff] %v34_v11 }
  0x12   :  { %47 = dma.vmem_to_hbm [thread:$0]  %s43_s12, 256, %s45_s14, [#allocation4]  }
  0x13   :  { %106 = dma.done.wait [#allocation4], 256  }
  0x14   :  { %107 = vsyncadd [#allocation4], 4294967040 }
  0x15   :  { %52 = vsyncpa [#allocation3], 1 }
  0x16   :  { %53 = vsyncpa [#allocation4], 1 }

</bundles_post_ra>
